<compile_context>
chip_gen: v5e
topology: v5e:2x2
jax: 0.10.0
libtpu: 0.0.40
codegen_flags: <defaults>
</compile_context>

<pallas_src>
import math

import jax
import jax.numpy as jnp
from jax.experimental import pallas as pl
from jax.experimental.pallas import tpu as pltpu

_LOG2 = math.log(2.0)
_LANES = 128
_TARGET_BLOCK_BYTES = 1 * 1024 * 1024  # ~85% of HBM roofline; VMEM-safe on v5e.


def _shifted_softplus_kernel(x_ref, params_ref, o_ref):
    """o = (softplus(beta*x) - log2) * scale + lin * x  (all elementwise).

    params rows: 0 = beta, 1 = scale = where(beta!=0, alpha/beta, 0),
                 2 = lin   = where(beta==0, 0.5*alpha,   0).
    On beta==0 lanes the softplus term contributes exactly 0 (scale==0), and on
    beta!=0 lanes the linear term contributes exactly 0 (lin==0), so this matches
    the reference `where` without any per-tile compare/select.
    """
    x = x_ref[...].astype(jnp.float32)          # upcast once (bf16 or f32 input)
    beta = params_ref[0:1, :]                   # (1, tile_w) f32, lane-broadcast
    scale = params_ref[1:2, :]
    lin = params_ref[2:3, :]
    z = beta * x
    # Numerically stable softplus: one exp + one log1p (EUP) per element.
    sp = jnp.maximum(z, 0.0) + jnp.log1p(jnp.exp(-jnp.abs(z)))
    o_ref[...] = ((sp - _LOG2) * scale + lin * x).astype(o_ref.dtype)


def _round_up(n, m):
    return ((n + m - 1) // m) * m


def _sublane_align(dtype):
    # f32 -> 8, bf16 -> 16 (packed sublanes), int8/fp8 -> 32.
    return {4: 8, 2: 16, 1: 32}[jnp.dtype(dtype).itemsize]


def shifted_softplus(x, alpha, beta):
    """x: (..., F) float32 or bfloat16; alpha, beta: (F,) parameters."""
    F = x.shape[-1]
    assert alpha.shape == (F,) and beta.shape == (F,)
    assert x.dtype in (jnp.dtype("float32"), jnp.dtype("bfloat16")), x.dtype
    orig_shape = x.shape
    orig_dtype = x.dtype
    itemsize = jnp.dtype(orig_dtype).itemsize
    sub = _sublane_align(orig_dtype)

    # ---- lane-dense fold: view (B, F) as (rows, W = F*g) with W % 128 == 0 ----
    g = _LANES // math.gcd(F, _LANES)            # W = F*g = lcm(F, 128)
    W = F * g
    B = 1
    for d in orig_shape[:-1]:
        B *= d
    x2 = x.reshape(B, F)

    # Pad batch so rows is sublane-aligned — never take the lane-sparse path.
    rows = _round_up(pl.cdiv(B, g), sub)
    pad = rows * g - B
    if pad:
        x2 = jnp.pad(x2, ((0, pad), (0, 0)))
    x2 = x2.reshape(rows, W)

    # ---- per-lane coefficients (f32), packed into one (3, W) resident operand --
    alpha_row = jnp.tile(alpha.astype(jnp.float32), g)
    beta_row = jnp.tile(beta.astype(jnp.float32), g)
    nonzero = beta_row != 0.0
    scale_row = jnp.where(nonzero, alpha_row / jnp.where(nonzero, beta_row, 1.0), 0.0)
    lin_row = jnp.where(nonzero, 0.0, 0.5 * alpha_row)
    params = jnp.stack([beta_row, scale_row, lin_row], axis=0)   # (3, W) f32

    # ---- block sizing ----------------------------------------------------------
    bytes_per_row = W * itemsize
    if bytes_per_row <= _TARGET_BLOCK_BYTES:
        tile_w = W
    else:
        # Very wide feature dim: tile the lane axis too (2-D grid) instead of
        # shrinking the row dim below a full (8, 128) tile.
        tile_w = max(_LANES,
                     min(W, (_TARGET_BLOCK_BYTES // (sub * itemsize))
                            // _LANES * _LANES))
    budget_rows = max(sub,
                      (_TARGET_BLOCK_BYTES // (tile_w * itemsize)) // sub * sub)
    tile_rows = min(rows, budget_rows)

    # Keep >= 2 grid steps whenever there is enough work: pipelining on all
    # generations, and dual-TensorCore split of the parallel axis on v7x.
    n_r = pl.cdiv(rows, tile_rows)
    n_w = pl.cdiv(W, tile_w)
    if n_r * n_w < 2 and rows >= 2 * sub:
        tile_rows = _round_up(rows // 2, sub)
        n_r = pl.cdiv(rows, tile_rows)

    grid = (n_r, n_w)

    out = pl.pallas_call(
        _shifted_softplus_kernel,
        out_shape=jax.ShapeDtypeStruct((rows, W), orig_dtype),
        grid_spec=pltpu.PrefetchScalarGridSpec(
            num_scalar_prefetch=0,
            grid=grid,
            in_specs=[
                pl.BlockSpec((tile_rows, tile_w), lambda i, j: (i, j)),
                pl.BlockSpec((3, tile_w), lambda i, j: (0, j)),
            ],
            out_specs=pl.BlockSpec((tile_rows, tile_w), lambda i, j: (i, j)),
        ),
        compiler_params=pltpu.CompilerParams(
            dimension_semantics=("parallel", "parallel"),
        ),
    )(x2, params)

    out = out.reshape(rows * g, F)
    if pad:
        out = out[:B]
    return out.reshape(orig_shape)


def reference(x, alpha, beta):
    x = x.astype(jnp.float32)
    z = beta * x
    sp = jnp.logaddexp(0.0, z)
    safe_beta = jnp.where(beta != 0, beta, 1.0)
    return alpha * jnp.where(beta != 0, (sp - _LOG2) / safe_beta, 0.5 * x)


if __name__ == "__main__":
    num_features = 32
    batch = 16

    key = jax.random.PRNGKey(0)
    k1, k2, k3, k4 = jax.random.split(key, 4)
    x = jax.random.normal(k1, (batch, num_features), dtype=jnp.float32)

    # Module init (reset_parameters): alpha = 1.0, beta = 1.0.
    alpha = jnp.full((num_features,), 1.0, dtype=jnp.float32)
    beta = jnp.full((num_features,), 1.0, dtype=jnp.float32)

    out = jax.block_until_ready(shifted_softplus(x, alpha, beta))
    ref = reference(x, alpha, beta)
    assert out.shape == x.shape and out.dtype == x.dtype
    assert jnp.max(jnp.abs(out - ref)) < 1e-5

    # Batch not divisible by the fold factor (g=4 for F=32) -> padding path,
    # arbitrary per-feature params including the beta == 0 (0.5*alpha*x) branch.
    x_odd = jax.random.normal(k2, (10, num_features), dtype=jnp.float32)
    alpha2 = jax.random.normal(k3, (num_features,), dtype=jnp.float32)
    beta2 = jax.random.normal(k4, (num_features,), dtype=jnp.float32).at[3].set(0.0)
    out2 = jax.block_until_ready(shifted_softplus(x_odd, alpha2, beta2))
    assert jnp.max(jnp.abs(out2 - reference(x_odd, alpha2, beta2))) < 1e-5

    # bf16 activations: upcast-in-kernel path with dtype-aware sublane alignment.
    x_bf16 = x.astype(jnp.bfloat16)
    out3 = jax.block_until_ready(shifted_softplus(x_bf16, alpha2, beta2))
    ref3 = reference(x_bf16, alpha2, beta2)
    assert out3.shape == x.shape and out3.dtype == jnp.bfloat16
    assert jnp.max(jnp.abs(out3.astype(jnp.float32) - ref3)) < 5e-2

    print("KERNEL_OK")
</pallas_src>

<mosaic_0001>
module attributes {stable_mosaic.version = 11 : i64} {
  func.func @_shifted_softplus_kernel(%arg0: i32, %arg1: i32, %arg2: memref<8x128xf32, #tpu.memory_space<vmem>>, %arg3: memref<3x128xf32, #tpu.memory_space<vmem>>, %arg4: memref<8x128xf32, #tpu.memory_space<vmem>>) attributes {dimension_semantics = [#tpu.dimension_semantics<parallel>, #tpu.dimension_semantics<parallel>], iteration_bounds = array<i64: 1, 1>, scalar_prefetch = 0 : i64, scratch_operands = 0 : i64, tpu.core_type = #tpu.core_type<tc>, window_params = [{transform_indices = @transform_0, window_bounds = array<i64: 8, 128>}, {transform_indices = @transform_1, window_bounds = array<i64: 3, 128>}, {transform_indices = @transform_2, window_bounds = array<i64: 8, 128>}]} {
    %c0 = arith.constant 0 : index
    %c0_0 = arith.constant 0 : index
    %0 = vector.load %arg2[%c0, %c0_0] : memref<8x128xf32, #tpu.memory_space<vmem>>, vector<8x128xf32>
    %c0_1 = arith.constant 0 : index
    %c0_2 = arith.constant 0 : index
    %1 = vector.load %arg3[%c0_1, %c0_2] : memref<3x128xf32, #tpu.memory_space<vmem>>, vector<1x128xf32>
    %c1 = arith.constant 1 : index
    %c0_3 = arith.constant 0 : index
    %2 = vector.load %arg3[%c1, %c0_3] : memref<3x128xf32, #tpu.memory_space<vmem>>, vector<1x128xf32>
    %c2 = arith.constant 2 : index
    %c0_4 = arith.constant 0 : index
    %3 = vector.load %arg3[%c2, %c0_4] : memref<3x128xf32, #tpu.memory_space<vmem>>, vector<1x128xf32>
    %4 = vector.broadcast %1 : vector<1x128xf32> to vector<8x128xf32>
    %5 = arith.mulf %4, %0 : vector<8x128xf32>
    %cst = arith.constant 0.000000e+00 : f32
    %6 = vector.broadcast %cst : f32 to vector<8x128xf32>
    %7 = arith.maximumf %5, %6 : vector<8x128xf32>
    %8 = math.absf %5 : vector<8x128xf32>
    %cst_5 = arith.constant 0.000000e+00 : f32
    %9 = vector.broadcast %cst_5 : f32 to vector<8x128xf32>
    %10 = arith.subf %9, %8 : vector<8x128xf32>
    %11 = math.exp %10 : vector<8x128xf32>
    %12 = math.log1p %11 : vector<8x128xf32>
    %13 = arith.addf %7, %12 : vector<8x128xf32>
    %cst_6 = arith.constant 0.693147182 : f32
    %14 = vector.broadcast %cst_6 : f32 to vector<8x128xf32>
    %15 = arith.subf %13, %14 : vector<8x128xf32>
    %16 = vector.broadcast %2 : vector<1x128xf32> to vector<8x128xf32>
    %17 = arith.mulf %15, %16 : vector<8x128xf32>
    %18 = vector.broadcast %3 : vector<1x128xf32> to vector<8x128xf32>
    %19 = arith.mulf %18, %0 : vector<8x128xf32>
    %20 = arith.addf %17, %19 : vector<8x128xf32>
    %c0_7 = arith.constant 0 : index
    %c0_8 = arith.constant 0 : index
    %21 = vector.load %arg4[%c0_7, %c0_8] : memref<8x128xf32, #tpu.memory_space<vmem>>, vector<8x128xf32>
    tpu.vector_store %arg4[%c0_7, %c0_8], %20 {strides = array<i32>} : memref<8x128xf32, #tpu.memory_space<vmem>>, vector<8x128xf32>,
    return
  }
  func.func @transform_0(%arg0: i32, %arg1: i32) -> (i32, i32) {
    %c0_i32 = arith.constant 0 : i32
    return %arg0, %arg1 : i32, i32
  }
  func.func @transform_1(%arg0: i32, %arg1: i32) -> (i32, i32) {
    %c0_i32 = arith.constant 0 : i32
    %c0_i32_0 = arith.constant 0 : i32
    return %c0_i32, %arg1 : i32, i32
  }
  func.func @transform_2(%arg0: i32, %arg1: i32) -> (i32, i32) {
    %c0_i32 = arith.constant 0 : i32
    return %arg0, %arg1 : i32, i32
  }
}

</mosaic_0001>

<bundles_post_ra>
// kernel: tpu_custom_call.1
= control target key start
LH: loop header
LB: loop body
LE: loop exit
PB: predicated region body
PF: predicated region fallthrough
CT: control target
= control target key end

     0   :  { %7 = vsyncpa [#allocation3], 0  ;;  %s202_s0 = inlined_call_operand.hbm [shape: f32[8,128], index: 0, kind: input, shape index: {}]   ;;  %s203_s1 = inlined_call_operand.hbm [shape: f32[3,128], index: 1, kind: input, shape index: {}]   ;;  %s204_s2 = inlined_call_operand.hbm [shape: f32[8,128], index: 2, kind: output, shape index: {}]  }
   0x1   :  { %8 = vsyncpa [#allocation6], 0 }
   0x2   :  { %9 = vsyncpa [#allocation4], 0  ;;  %s15_s11 = sshll.u32 %s202_s0, 4  ;;  %s175_s12 = smov [#allocation2]   ;;  %s16_s11 = int_to_ptr.hbm [resolvable:$true] %s15_s11 }
   0x3   :  { %s17_s13 = sshll.u32 %s175_s12, 4  ;;  %s26_s16 = sshll.u32 %s203_s1, 4  ;;  %s18_s13 = int_to_ptr.vmem [resolvable:$true] %s17_s13  ;;  %s27_s16 = int_to_ptr.hbm [resolvable:$true] %s26_s16 }
   0x4   :  { %20 = dma.hbm_to_vmem [thread:$0]  %s16_s11, 128, %s18_s13, [#allocation3]  }
   0x5   :  { %s176_s17 = smov [#allocation5]  }
   0x6   :  { %s28_s18 = sshll.u32 %s176_s17, 4  ;;  %s29_s18 = int_to_ptr.vmem [resolvable:$true] %s28_s18 }
   0x7   :  { %31 = dma.hbm_to_vmem [thread:$0]  %s27_s16, 64, %s29_s18, [#allocation6]  }
   0x8   :  { %169 = dma.done.wait [#allocation3], 128  }
   0x9   :  { %170 = vsyncadd [#allocation3], 4294967168 }
   0xa   :  { %171 = dma.done.wait [#allocation6], 64  }
   0xb   :  { %172 = vsyncadd [#allocation6], 4294967232  ;;  %v40_v0 = vld [vmem:[#allocation2] sm:$0xff]  ;;  %v90_v1 = vld [vmem:[#allocation5] ss:$0 sm:$0xff]  ;;  %s177_s0 = smov [#allocation7]  }
   0xc   :  { %v45_v2 = vmul.f32 %v90_v1, %v40_v0  ;;  %v92_v15 = vld [vmem:[#allocation5 + $0x2] ss:$0 sm:$0xff]  ;;  %v91_v18 = vld [vmem:[#allocation5 + $0x1] ss:$0 sm:$0xff]  ;;  %s73_s1 = sshll.u32 %s177_s0, 4  ;;  %s75_s21 = sshll.u32 %s204_s2, 4  ;;  %s74_s1 = int_to_ptr.vmem [resolvable:$true] %s73_s1  ;;  %s76_s21 = int_to_ptr.hbm [resolvable:$true] %s75_s21 }
   0xd   :  { %v65_v20 = vmul.f32 %v92_v15, %v40_v0 }
   0xe   :  { %v47_v3 = vand.u32 2147483647, %v45_v2  ;;  %v46_v13 = vmax.f32 %v45_v2, 0.0 }
  0x10   :  { %v48_v4 = vsub.f32 0.0, %v47_v3 }
  0x12   :  { %v49_v5 = vmul.f32 1.442695, %v48_v4 }
  0x14   :  { %93 = vpow2.f32 %v49_v5 }
  0x1a   :  { %v94_v6 = vpop.eup %93 }
  0x1b   :  { %v51_v7 = vadd.f32 1.0, %v94_v6  ;;  %v54_v8 = vmul.f32 -0.5, %v94_v6  ;;  %v57_v10 = vand.u32 2147483647, %v94_v6 }
  0x1d   :  { %95 = vlog2.f32 %v51_v7  ;;  %v55_v9 = vadd.f32 1.0, %v54_v8  ;;  %vm58_vm0 = vcmp.lt.f32.partialorder %v57_v10, 0.0004427343 }
  0x1f   :  { %v56_v11 = vmul.f32 %v94_v6, %v55_v9 }
  0x23   :  { %v96_v12 = vpop.eup %95 }
  0x24   :  { %v53_v14 = vmul.f32 0.6931472, %v96_v12 }
  0x26   :  { %v59_v16 = vsel %vm58_vm0, %v56_v11, %v53_v14 }
  0x27   :  { %v60_v17 = vadd.f32 %v59_v16, %v46_v13 }
  0x29   :  { %v86_v19 = vadd.f32 -0.6931472, %v60_v17 }
  0x2b   :  { %v63_v21 = vmul.f32 %v91_v18, %v86_v19 }
  0x2d   :  { %v66_v22 = vadd.f32 %v65_v20, %v63_v21 }
  0x2f   :  { %67 = vst [vmem:[#allocation7] sm:$0xff] %v66_v22 }
  0x30   :  { %78 = dma.vmem_to_hbm [thread:$0]  %s74_s1, 128, %s76_s21, [#allocation4]  }
  0x31   :  { %173 = dma.done.wait [#allocation4], 128  }
  0x32   :  { %174 = vsyncadd [#allocation4], 4294967168 }
  0x33   :  { %83 = vsyncpa [#allocation3], 1 }
  0x34   :  { %84 = vsyncpa [#allocation6], 1 }
  0x35   :  { %85 = vsyncpa [#allocation4], 1 }

</bundles_post_ra>
